<compile_context>
chip_gen: v7x
topology: tpu7x:2x2x1
jax: 0.10.0
libtpu: 0.0.40
codegen_flags: <defaults>
</compile_context>

<pallas_src>
import jax
import jax.numpy as jnp
from jax import lax
from jax.experimental import pallas as pl
from jax.experimental.pallas import tpu as pltpu

LANES = 128  # lane-dense output slab width


def _gcn_kernel(adj_ref, din_ref, dout_ref, x_ref,
                w1_ref, b1_ref, w2_ref, b2_ref, wl_ref, bl_ref,
                out_ref):
    adj = adj_ref[0]                                      # [N, N]   adj[dst, src]
    inv_in = lax.rsqrt(jnp.maximum(din_ref[0], 1.0))      # [N, 1]   d_in(dst)^-1/2
    inv_out = lax.rsqrt(jnp.maximum(dout_ref[0], 1.0))    # [N, 1]   d_out(src)^-1/2

    # conv1: rsqrt(d_in) * (A @ ((rsqrt(d_out) * X) @ W1)) + b1 ; ReLU
    h = jnp.dot(x_ref[0] * inv_out, w1_ref[...], preferred_element_type=jnp.float32)
    h = inv_in * jnp.dot(adj, h, preferred_element_type=jnp.float32) + b1_ref[...]
    h = jnp.maximum(h, 0.0)

    # conv2: rsqrt(d_in) * (A @ ((rsqrt(d_out) * H) @ W2)) + b2 ; ReLU
    h = jnp.dot(h * inv_out, w2_ref[...], preferred_element_type=jnp.float32)
    h = inv_in * jnp.dot(adj, h, preferred_element_type=jnp.float32) + b2_ref[...]
    h = jnp.maximum(h, 0.0)

    # Epilogue (VPU only): sum over nodes then Linear(h2, 1) fused into one reduce:
    #   out = sum_{n,f} h[n,f] * Wl[0,f] + bl
    contrib = jnp.sum(h * wl_ref[...], axis=1, keepdims=True)          # [N, 1]
    out_val = jnp.sum(contrib, axis=0, keepdims=True) + bl_ref[...]    # [1, 1]
    out_ref[0] = jnp.broadcast_to(out_val, (1, LANES))                 # lane-dense store


def gcn_forward(adj, deg_in, deg_out, x, w1, b1, w2, b2, wl, bl):
    """Batched Pallas wrapper.

    adj     [B, N, N]  weighted adjacency, adj[b, dst, src] = edge dist (0 if no edge)
    deg_in  [B, N, 1]  structural in-degree  of each dst node
    deg_out [B, N, 1]  structural out-degree of each src node
    x       [B, N, F_in] node features
    w1/b1, w2/b2       GraphDistConv params (shared across graphs)
    wl [1, h2], bl [1,1]  torch-layout Linear(h2, 1) params
    Returns [B, 1] — the original module's forward applied independently per graph.
    """
    B, N, _ = adj.shape
    f_in = x.shape[-1]
    h1 = w1.shape[1]
    h2 = w2.shape[1]

    def batched(shape):
        nd = len(shape)
        return pl.BlockSpec((1,) + shape, lambda b, _nd=nd: (b,) + (0,) * _nd)

    def shared(shape):
        nd = len(shape)
        return pl.BlockSpec(shape, lambda b, _nd=nd: (0,) * _nd)

    out = pl.pallas_call(
        _gcn_kernel,
        out_shape=jax.ShapeDtypeStruct((B, 1, LANES), jnp.float32),
        grid=(B,),
        in_specs=[
            batched((N, N)),       # adj
            batched((N, 1)),       # deg_in
            batched((N, 1)),       # deg_out
            batched((N, f_in)),    # x
            shared((f_in, h1)),    # w1
            shared((1, h1)),       # b1
            shared((h1, h2)),      # w2
            shared((1, h2)),       # b2
            shared((1, h2)),       # wl  (torch Linear.weight, [out=1, in=h2])
            shared((1, 1)),        # bl
        ],
        out_specs=pl.BlockSpec((1, 1, LANES), lambda b: (b, 0, 0)),
        compiler_params=pltpu.CompilerParams(dimension_semantics=("parallel",)),
    )(adj, deg_in, deg_out, x, w1, b1, w2, b2, wl, bl)
    return out[:, 0, :1]           # [B, 1]


def gcn_reference(adj, mask, x, w1, b1, w2, b2, wl, bl):
    """Pure-JAX reference of the original torch forward, batched over graphs."""
    d_in = jnp.maximum(jnp.sum(mask, axis=2, keepdims=True), 1.0)    # [B, N, 1]
    d_out = jnp.maximum(jnp.sum(mask, axis=1, keepdims=True), 1.0)   # [B, 1, N]
    adj_n = adj * d_in ** -0.5 * d_out ** -0.5
    h = jnp.maximum(jnp.einsum("bij,bjf->bif", adj_n, x @ w1) + b1, 0.0)
    h = jnp.maximum(jnp.einsum("bij,bjf->bif", adj_n, h @ w2) + b2, 0.0)
    fp = jnp.sum(h, axis=1)                                          # [B, h2]
    return fp @ wl.T + bl                                            # [B, 1]


if __name__ == "__main__":
    # B graphs, N nodes each, feature sizes consistent with the module.
    B, N, in_feats, h1, h2 = 8, 8, 16, 32, 16

    key = jax.random.PRNGKey(0)
    k_mask, k_dist, k_x, k_w1, k_b1, k_w2, k_b2, k_wl, k_bl = jax.random.split(key, 9)

    # Graphs: random directed edges + edge distances (dist plays the role of edata['w']).
    mask = (jax.random.uniform(k_mask, (B, N, N)) > 0.5).astype(jnp.float32)  # [b, dst, src]
    dist = jax.random.uniform(k_dist, (B, N, N), minval=0.1, maxval=1.0)
    adj = mask * dist

    # Structural degrees (DGL's in_degrees()/out_degrees()); O(N) per graph, replaces the N^2 mask input.
    deg_in = jnp.sum(mask, axis=2)[..., None]     # [B, N, 1] in-degree of dst
    deg_out = jnp.sum(mask, axis=1)[..., None]    # [B, N, 1] out-degree of src

    # Node features and deterministic parameter init (shared across graphs).
    x = jax.random.normal(k_x, (B, N, in_feats), dtype=jnp.float32)
    w1 = jax.random.normal(k_w1, (in_feats, h1), dtype=jnp.float32) * 0.1
    b1 = jax.random.normal(k_b1, (1, h1), dtype=jnp.float32) * 0.1
    w2 = jax.random.normal(k_w2, (h1, h2), dtype=jnp.float32) * 0.1
    b2 = jax.random.normal(k_b2, (1, h2), dtype=jnp.float32) * 0.1
    wl = jax.random.normal(k_wl, (1, h2), dtype=jnp.float32) * 0.1    # torch Linear.weight [1, h2]
    bl = jax.random.normal(k_bl, (1, 1), dtype=jnp.float32) * 0.1

    out = gcn_forward(adj, deg_in, deg_out, x, w1, b1, w2, b2, wl, bl)
    jax.block_until_ready(out)

    ref = gcn_reference(adj, mask, x, w1, b1, w2, b2, wl, bl)
    assert out.shape == (B, 1), out.shape
    assert jnp.allclose(out, ref, rtol=1e-4, atol=1e-4), (out, ref)

    print("KERNEL_OK")
</pallas_src>

<mosaic_0001>
module attributes {stable_mosaic.version = 11 : i64} {
  func.func @_gcn_kernel(%arg0: i32, %arg1: memref<1x8x8xf32, #tpu.memory_space<vmem>>, %arg2: memref<1x8x1xf32, #tpu.memory_space<vmem>>, %arg3: memref<1x8x1xf32, #tpu.memory_space<vmem>>, %arg4: memref<1x8x16xf32, #tpu.memory_space<vmem>>, %arg5: memref<16x32xf32, #tpu.memory_space<vmem>>, %arg6: memref<1x32xf32, #tpu.memory_space<vmem>>, %arg7: memref<32x16xf32, #tpu.memory_space<vmem>>, %arg8: memref<1x16xf32, #tpu.memory_space<vmem>>, %arg9: memref<1x16xf32, #tpu.memory_space<vmem>>, %arg10: memref<1x1xf32, #tpu.memory_space<vmem>>, %arg11: memref<1x1x128xf32, #tpu.memory_space<vmem>>) attributes {dimension_semantics = [#tpu.dimension_semantics<parallel>], iteration_bounds = array<i64: 8>, scalar_prefetch = 0 : i64, scratch_operands = 0 : i64, tpu.core_type = #tpu.core_type<tc>, window_params = [{transform_indices = @transform_0, window_bounds = array<i64: 1, 8, 8>}, {transform_indices = @transform_1, window_bounds = array<i64: 1, 8, 1>}, {transform_indices = @transform_2, window_bounds = array<i64: 1, 8, 1>}, {transform_indices = @transform_3, window_bounds = array<i64: 1, 8, 16>}, {pipeline_mode = #tpu.pipeline_mode<synchronous>, transform_indices = @transform_4, window_bounds = array<i64: 16, 32>}, {pipeline_mode = #tpu.pipeline_mode<synchronous>, transform_indices = @transform_5, window_bounds = array<i64: 1, 32>}, {pipeline_mode = #tpu.pipeline_mode<synchronous>, transform_indices = @transform_6, window_bounds = array<i64: 32, 16>}, {pipeline_mode = #tpu.pipeline_mode<synchronous>, transform_indices = @transform_7, window_bounds = array<i64: 1, 16>}, {pipeline_mode = #tpu.pipeline_mode<synchronous>, transform_indices = @transform_8, window_bounds = array<i64: 1, 16>}, {pipeline_mode = #tpu.pipeline_mode<synchronous>, transform_indices = @transform_9, window_bounds = array<i64: 1, 1>}, {transform_indices = @transform_10, window_bounds = array<i64: 1, 1, 128>}]} {
    %c0 = arith.constant 0 : index
    %c0_0 = arith.constant 0 : index
    %c0_1 = arith.constant 0 : index
    %0 = vector.load %arg1[%c0, %c0_0, %c0_1] : memref<1x8x8xf32, #tpu.memory_space<vmem>>, vector<1x8x8xf32>
    %1 = vector.shape_cast %0 : vector<1x8x8xf32> to vector<8x8xf32>
    %c0_2 = arith.constant 0 : index
    %c0_3 = arith.constant 0 : index
    %c0_4 = arith.constant 0 : index
    %2 = vector.load %arg2[%c0_2, %c0_3, %c0_4] : memref<1x8x1xf32, #tpu.memory_space<vmem>>, vector<1x8x1xf32>
    %3 = vector.shape_cast %2 : vector<1x8x1xf32> to vector<8x1xf32>
    %cst = arith.constant 1.000000e+00 : f32
    %4 = vector.broadcast %cst : f32 to vector<8x1xf32>
    %5 = arith.maximumf %3, %4 : vector<8x1xf32>
    %6 = math.rsqrt %5 : vector<8x1xf32>
    %c0_5 = arith.constant 0 : index
    %c0_6 = arith.constant 0 : index
    %c0_7 = arith.constant 0 : index
    %7 = vector.load %arg3[%c0_5, %c0_6, %c0_7] : memref<1x8x1xf32, #tpu.memory_space<vmem>>, vector<1x8x1xf32>
    %8 = vector.shape_cast %7 : vector<1x8x1xf32> to vector<8x1xf32>
    %cst_8 = arith.constant 1.000000e+00 : f32
    %9 = vector.broadcast %cst_8 : f32 to vector<8x1xf32>
    %10 = arith.maximumf %8, %9 : vector<8x1xf32>
    %11 = math.rsqrt %10 : vector<8x1xf32>
    %c0_9 = arith.constant 0 : index
    %c0_10 = arith.constant 0 : index
    %c0_11 = arith.constant 0 : index
    %12 = vector.load %arg4[%c0_9, %c0_10, %c0_11] : memref<1x8x16xf32, #tpu.memory_space<vmem>>, vector<1x8x16xf32>
    %13 = vector.shape_cast %12 : vector<1x8x16xf32> to vector<8x16xf32>
    %14 = vector.broadcast %11 : vector<8x1xf32> to vector<8x16xf32>
    %15 = arith.mulf %13, %14 : vector<8x16xf32>
    %c0_12 = arith.constant 0 : index
    %c0_13 = arith.constant 0 : index
    %16 = vector.load %arg5[%c0_12, %c0_13] : memref<16x32xf32, #tpu.memory_space<vmem>>, vector<16x32xf32>
    %cst_14 = arith.constant dense<0.000000e+00> : vector<8x32xf32>
    %17 = tpu.matmul %15, %16, %cst_14 {dimension_numbers = #tpu.dot_dimension_numbers<[1], [0], [0], [1], [0, 0, 1, 1], [], []>} : vector<8x16xf32>, vector<16x32xf32>, vector<8x32xf32> -> vector<8x32xf32>
    %cst_15 = arith.constant dense<0.000000e+00> : vector<8x32xf32>
    %18 = tpu.matmul %1, %17, %cst_15 {dimension_numbers = #tpu.dot_dimension_numbers<[1], [0], [0], [1], [0, 0, 1, 1], [], []>} : vector<8x8xf32>, vector<8x32xf32>, vector<8x32xf32> -> vector<8x32xf32>
    %19 = vector.broadcast %6 : vector<8x1xf32> to vector<8x32xf32>
    %20 = arith.mulf %19, %18 : vector<8x32xf32>
    %c0_16 = arith.constant 0 : index
    %c0_17 = arith.constant 0 : index
    %21 = vector.load %arg6[%c0_16, %c0_17] : memref<1x32xf32, #tpu.memory_space<vmem>>, vector<1x32xf32>
    %22 = vector.broadcast %21 : vector<1x32xf32> to vector<8x32xf32>
    %23 = arith.addf %20, %22 : vector<8x32xf32>
    %cst_18 = arith.constant 0.000000e+00 : f32
    %24 = vector.broadcast %cst_18 : f32 to vector<8x32xf32>
    %25 = arith.maximumf %23, %24 : vector<8x32xf32>
    %26 = vector.broadcast %11 : vector<8x1xf32> to vector<8x32xf32>
    %27 = arith.mulf %25, %26 : vector<8x32xf32>
    %c0_19 = arith.constant 0 : index
    %c0_20 = arith.constant 0 : index
    %28 = vector.load %arg7[%c0_19, %c0_20] : memref<32x16xf32, #tpu.memory_space<vmem>>, vector<32x16xf32>
    %cst_21 = arith.constant dense<0.000000e+00> : vector<8x16xf32>
    %29 = tpu.matmul %27, %28, %cst_21 {dimension_numbers = #tpu.dot_dimension_numbers<[1], [0], [0], [1], [0, 0, 1, 1], [], []>} : vector<8x32xf32>, vector<32x16xf32>, vector<8x16xf32> -> vector<8x16xf32>
    %cst_22 = arith.constant dense<0.000000e+00> : vector<8x16xf32>
    %30 = tpu.matmul %1, %29, %cst_22 {dimension_numbers = #tpu.dot_dimension_numbers<[1], [0], [0], [1], [0, 0, 1, 1], [], []>} : vector<8x8xf32>, vector<8x16xf32>, vector<8x16xf32> -> vector<8x16xf32>
    %31 = vector.broadcast %6 : vector<8x1xf32> to vector<8x16xf32>
    %32 = arith.mulf %31, %30 : vector<8x16xf32>
    %c0_23 = arith.constant 0 : index
    %c0_24 = arith.constant 0 : index
    %33 = vector.load %arg8[%c0_23, %c0_24] : memref<1x16xf32, #tpu.memory_space<vmem>>, vector<1x16xf32>
    %34 = vector.broadcast %33 : vector<1x16xf32> to vector<8x16xf32>
    %35 = arith.addf %32, %34 : vector<8x16xf32>
    %cst_25 = arith.constant 0.000000e+00 : f32
    %36 = vector.broadcast %cst_25 : f32 to vector<8x16xf32>
    %37 = arith.maximumf %35, %36 : vector<8x16xf32>
    %c0_26 = arith.constant 0 : index
    %c0_27 = arith.constant 0 : index
    %38 = vector.load %arg9[%c0_26, %c0_27] : memref<1x16xf32, #tpu.memory_space<vmem>>, vector<1x16xf32>
    %39 = vector.broadcast %38 : vector<1x16xf32> to vector<8x16xf32>
    %40 = arith.mulf %37, %39 : vector<8x16xf32>
    %cst_28 = arith.constant dense<0.000000e+00> : vector<8xf32>
    %41 = vector.multi_reduction <add>, %40, %cst_28 [1] : vector<8x16xf32> to vector<8xf32>
    %42 = vector.shape_cast %41 : vector<8xf32> to vector<8x1xf32>
    %cst_29 = arith.constant dense<0.000000e+00> : vector<1xf32>
    %43 = vector.multi_reduction <add>, %42, %cst_29 [0] : vector<8x1xf32> to vector<1xf32>
    %44 = vector.shape_cast %43 : vector<1xf32> to vector<1x1xf32>
    %c0_30 = arith.constant 0 : index
    %c0_31 = arith.constant 0 : index
    %45 = vector.load %arg10[%c0_30, %c0_31] : memref<1x1xf32, #tpu.memory_space<vmem>>, vector<1x1xf32>
    %46 = arith.addf %44, %45 : vector<1x1xf32>
    %47 = vector.shape_cast %46 : vector<1x1xf32> to vector<1x1xf32>
    %48 = vector.broadcast %47 : vector<1x1xf32> to vector<1x128xf32>
    %c0_32 = arith.constant 0 : index
    %c0_33 = arith.constant 0 : index
    %c0_34 = arith.constant 0 : index
    %49 = vector.load %arg11[%c0_32, %c0_33, %c0_34] : memref<1x1x128xf32, #tpu.memory_space<vmem>>, vector<1x1x128xf32>
    %50 = vector.shape_cast %49 : vector<1x1x128xf32> to vector<1x128xf32>
    %51 = vector.shape_cast %48 : vector<1x128xf32> to vector<1x1x128xf32>
    tpu.vector_store %arg11[%c0_32, %c0_33, %c0_34], %51 {strides = array<i32>} : memref<1x1x128xf32, #tpu.memory_space<vmem>>, vector<1x1x128xf32>,
    return
  }
  func.func @transform_0(%arg0: i32) -> (i32, i32, i32) {
    %c0_i32 = arith.constant 0 : i32
    %c0_i32_0 = arith.constant 0 : i32
    %c0_i32_1 = arith.constant 0 : i32
    return %arg0, %c0_i32, %c0_i32_0 : i32, i32, i32
  }
  func.func @transform_1(%arg0: i32) -> (i32, i32, i32) {
    %c0_i32 = arith.constant 0 : i32
    %c0_i32_0 = arith.constant 0 : i32
    %c0_i32_1 = arith.constant 0 : i32
    return %arg0, %c0_i32, %c0_i32_0 : i32, i32, i32
  }
  func.func @transform_2(%arg0: i32) -> (i32, i32, i32) {
    %c0_i32 = arith.constant 0 : i32
    %c0_i32_0 = arith.constant 0 : i32
    %c0_i32_1 = arith.constant 0 : i32
    return %arg0, %c0_i32, %c0_i32_0 : i32, i32, i32
  }
  func.func @transform_3(%arg0: i32) -> (i32, i32, i32) {
    %c0_i32 = arith.constant 0 : i32
    %c0_i32_0 = arith.constant 0 : i32
    %c0_i32_1 = arith.constant 0 : i32
    return %arg0, %c0_i32, %c0_i32_0 : i32, i32, i32
  }
  func.func @transform_4(%arg0: i32) -> (i32, i32) {
    %c0_i32 = arith.constant 0 : i32
    %c0_i32_0 = arith.constant 0 : i32
    %c0_i32_1 = arith.constant 0 : i32
    return %c0_i32, %c0_i32_0 : i32, i32
  }
  func.func @transform_5(%arg0: i32) -> (i32, i32) {
    %c0_i32 = arith.constant 0 : i32
    %c0_i32_0 = arith.constant 0 : i32
    %c0_i32_1 = arith.constant 0 : i32
    return %c0_i32, %c0_i32_0 : i32, i32
  }
  func.func @transform_6(%arg0: i32) -> (i32, i32) {
    %c0_i32 = arith.constant 0 : i32
    %c0_i32_0 = arith.constant 0 : i32
    %c0_i32_1 = arith.constant 0 : i32
    return %c0_i32, %c0_i32_0 : i32, i32
  }
  func.func @transform_7(%arg0: i32) -> (i32, i32) {
    %c0_i32 = arith.constant 0 : i32
    %c0_i32_0 = arith.constant 0 : i32
    %c0_i32_1 = arith.constant 0 : i32
    return %c0_i32, %c0_i32_0 : i32, i32
  }
  func.func @transform_8(%arg0: i32) -> (i32, i32) {
    %c0_i32 = arith.constant 0 : i32
    %c0_i32_0 = arith.constant 0 : i32
    %c0_i32_1 = arith.constant 0 : i32
    return %c0_i32, %c0_i32_0 : i32, i32
  }
  func.func @transform_9(%arg0: i32) -> (i32, i32) {
    %c0_i32 = arith.constant 0 : i32
    %c0_i32_0 = arith.constant 0 : i32
    %c0_i32_1 = arith.constant 0 : i32
    return %c0_i32, %c0_i32_0 : i32, i32
  }
  func.func @transform_10(%arg0: i32) -> (i32, i32, i32) {
    %c0_i32 = arith.constant 0 : i32
    %c0_i32_0 = arith.constant 0 : i32
    %c0_i32_1 = arith.constant 0 : i32
    return %arg0, %c0_i32, %c0_i32_0 : i32, i32, i32
  }
}

</mosaic_0001>

<bundles_post_ra>
// kernel: tpu_custom_call.1
= control target key start
LH: loop header
LB: loop body
LE: loop exit
PB: predicated region body
PF: predicated region fallthrough
CT: control target
= control target key end

     0   :  { %s1265_s0 = inlined_call_operand.vmem [shape: f32[8,8,8], index: 0, kind: input, shape index: {}]   ;;  %s1266_s1 = inlined_call_operand.vmem [shape: f32[8,8,1], index: 1, kind: input, shape index: {}]   ;;  %s1267_s2 = inlined_call_operand.vmem [shape: f32[8,8,1], index: 2, kind: input, shape index: {}]   ;;  %s1268_s3 = inlined_call_operand.vmem [shape: f32[8,8,16], index: 3, kind: input, shape index: {}]   ;;  %s1269_s4 = inlined_call_operand.vmem [shape: f32[16,32], index: 4, kind: input, shape index: {}]   ;;  %s1270_s5 = inlined_call_operand.vmem [shape: f32[1,32], index: 5, kind: input, shape index: {}]   ;;  %s1271_s6 = inlined_call_operand.vmem [shape: f32[32,16], index: 6, kind: input, shape index: {}]   ;;  %s1272_s7 = inlined_call_operand.vmem [shape: f32[1,16], index: 7, kind: input, shape index: {}]   ;;  %s1273_s8 = inlined_call_operand.vmem [shape: f32[1,16], index: 8, kind: input, shape index: {}]   ;;  %s1274_s9 = inlined_call_operand.<no memory space> [shape: f32[1,1], index: 9, kind: input, shape index: {}]   ;;  %s1275_s10 = inlined_call_operand.hbm [shape: f32[8,1,128], index: 10, kind: output, shape index: {}]  }
   0x1   :  { %v15_v0 = vstv %s1274_s9 }
   0x2   :  { %16 = vst [vmem:[#allocation2] sm:$0x1] %v15_v0 }
   0x3   :  { %17 = vsyncpa [#allocation4], 0 }
   0x4   :  { %19 = vsyncpa [#allocation4 + $0x1], 0  ;;  %s1121_s15 = smov 0   ;;  %s1123_s16 = smov 0  }
   0x5   :  { %s1125_s17 = smov 0   ;;  %s1127_s18 = smov 0  }
   0x6 LB: > { %s1142_s9 = sadd.s32 4294967295, %s1056_s18   ;;  %s878_s19 = sadd.s32 4294967294, %s1056_s18   ;;  %s1056_s18 = sphi %s1127_s18, %s1281_s18   ;;  %s1052_s17 = sphi %s1125_s17, %s1280_s17   ;;  %s1048_s16 = sphi %s1123_s16, %s1279_s16   ;;  %s1044_s15 = sphi %s1121_s15, %s1278_s15  }
   0x7   : > { %s1146_s20 = sadd.s32 1, %s1056_s18   ;;  %s262_s21 = sadd.s32 1, %s1052_s17 }
   0x8   : > { %s259_s22 = ssub.s32 %s1056_s18, %s1146_s20  ;;  %p272_p0 = scmp.ne.s32.totalorder %s1052_s17, %s1048_s16 }
   0x9   : > { %p260_p1 = scmp.eq.s32.totalorder %s259_s22, 0  ;;  %p273_p2 = scmp.eq.s32.totalorder %s1142_s9, 7 }
   0xa   : > { %p278_p3 = scmp.ne.s32.totalorder %s1048_s16, %s1044_s15  ;;  %p279_p4 = scmp.eq.s32.totalorder %s878_s19, 7 }
   0xb   : > { %s1157_s23 = scalar_select %p260_p1, %s1052_s17, %s262_s21  }
   0xc   : > { %p1159_p5 = por %p273_p2, %p272_p0  ;;  %p1163_p6 = por %p279_p4, %p278_p3 }
   0xd   : > { %p881_p7 = scmp.ge.s32.totalorder %s1056_s18, 1  ;;  %p343_p8 = scmp.lt.s32.totalorder %s1056_s18, 9 }
   0xf   : > { %p344_p9 = pnand %p881_p7, %p343_p8 }
  0x10   : > { %p391_p10 = scmp.lt.s32.totalorder (!%p344_p9), %s1142_s9, 7  ;;  %v421_v1 = vld [vmem:[%s1269_s4] sm:$0xff] (!%p344_p9)  ;;  %v422_v2 = vld [vmem:[%s1269_s4 + $0x8] sm:$0xff] (!%p344_p9)  ;;  %v1058_v3 = vmov (!%p344_p9), 0   ;;  %v1059_v4 = vmov (!%p344_p9), 0.0|0.0   ;;  %vm1060_vm0 = vmmov (!%p344_p9), 0   ;;  %v769_v53 = vlaneseq (!%p344_p9) }
  0x11   : > { %347 = sbr.rel (%p344_p9) target bundleno = 1339 (0x53b), region = 60  ;;  %988 = vset.pattern.permute.xlu0 (!%p344_p9), %v1058_v3  ;;  %936 = vmatprep.subr.bf16.mxu0 (!%p344_p9), %v1059_v4  ;;  %v937_v5 = vpack.c.bf16 (!%p344_p9), %v422_v2, %v421_v1  ;;  %v1061_v12 = vmov (!%p344_p9), 0.0   ;;  %vm423_vm1 = vcmask (!%p344_p9), 130048   ;;  %vm497_vm2 = vcmask (!%p344_p9), 64512   ;;  %v587_v19 = vld [vmem:[%s1271_s6] sm:$0xff] (!%p344_p9)  ;;  %v588_v20 = vld [vmem:[%s1271_s6 + $0x8] sm:$0xff] (!%p344_p9) }
  0x12   : > { %989 = vset.pattern.permute.xlu1 (!%p344_p9), %v1058_v3  ;;  %912 = vmatprep.mubr.msk.f32.mxu0 (!%p344_p9), %vm1060_vm0, %v1061_v12  ;;  %v940_v21 = vpack.c.bf16 (!%p344_p9), %v588_v20, %v587_v19  ;;  %v589_v22 = vld [vmem:[%s1271_s6 + $0x10] sm:$0xff] (!%p344_p9)  ;;  %v590_v23 = vld [vmem:[%s1271_s6 + $0x18] sm:$0xff] (!%p344_p9)  ;;  %v888_v27 = vld [vmem:[%s1270_s5] ss:$0 sm:$0xff] (!%p344_p9)  ;;  %vm591_vm3 = vcmask (!%p344_p9), 261120   ;;  %s389_s19 = sand.u32 (!%p344_p9), 1, %s1048_s16  }
  0x13   : > { %938 = vmatpush3.bf16.msra.mxu0 (!%p344_p9), %v937_v5  ;;  %915 = vmatprep.subr.mxu1 (!%p344_p9), %v1061_v12  ;;  %v943_v24 = vpack.c.bf16 (!%p344_p9), %v590_v23, %v589_v22  ;;  %v891_v36 = vld [vmem:[%s1272_s7] ss:$0 sm:$0xff] (!%p344_p9)  ;;  %v770_v54 = vshrl.u32 (!%p344_p9), %v769_v53, 7  ;;  %s893_s21 = sshll.u32 (!%p344_p9), %s1142_s9, 4  ;;  %s775_s29 = scalar_lea.sflag (!%p344_p9), [#allocation4], %s389_s19 }
  0x14   : > { %917 = vmatprep.mubr.msk.f32.mxu1 (!%p344_p9), %vm1060_vm0, %v1061_v12  ;;  %931 = vmatprep.subr.mxu0 (!%p344_p9), %v1061_v12  ;;  %v892_v40 = vld [vmem:[%s1273_s8] ss:$0 sm:$0xff] (!%p344_p9) }
  0x15   : > { %v762_v50 = vld [vmem:[#allocation2] sm:$0x1] (!%p344_p9)  ;;  %v771_v55 = vsub.s32 (!%p344_p9), 0, %v770_v54 }
  0x18   : > { %s392_s30 = scalar_select %p391_p10, %s1142_s9, 7 }
  0x19   : > { %s1062_s9 = smov [#allocation3]  }
  0x1a   : > { %s882_s11 = sshll.u32 %s392_s30, 3 }
  0x1b   : > { %s402_s14 = scalar_lea.vmem %s1267_s2, %s882_s11  ;;  %s398_s22 = scalar_lea.vmem %s1266_s1, %s882_s11 }
  0x1c   : > { %v411_v6 = vld [vmem:[%s402_s14] sm:$0xff]  ;;  %s406_s28 = scalar_lea.vmem %s1268_s3, %s882_s11  ;;  %s394_s12 = scalar_lea.vmem %s1265_s0, %s882_s11 }
  0x1d   : > { %v408_v7 = vld [vmem:[%s398_s22] sm:$0xff]  ;;  %v412_v8 = vmax.f32 %v411_v6, 1.0  ;;  %s390_s11 = scalar_lea.vmem [#allocation3], %s389_s19 }
  0x1e   : > { %v409_v9 = vmax.f32 %v408_v7, 1.0  ;;  %v414_v13 = vld [vmem:[%s406_s28] sm:$0xff]  ;;  %s787_s22 = sshll.u32 %s390_s11, 4  ;;  %s1223_s28 = scalar_lea.hbm %s1275_s10, %s893_s21  ;;  %s1225_s22 = int_to_ptr.vmem [resolvable:$true] %s787_s22 }
  0x1f   : > { %990 = vrsqrt.f32 %v412_v8  ;;  %v407_v16 = vld [vmem:[%s394_s12] sm:$0xff]  ;;  %s994_s30 = scalar_lea.vmem %s1225_s22, 16  ;;  %s998_s12 = sshll.u32 %s1062_s9, 4  ;;  %s999_s12 = int_to_ptr.vmem [resolvable:$false] %s998_s12 }
  0x20   : > { %992 = vrsqrt.f32 %v409_v9  ;;  %p995_p11 = scmp.ne.s32.totalorder %s1225_s22, %s994_s30  ;;  %s1000_s13 = scalar_lea.vmem %s999_s12, 32 }
  0x21   : > { %p1001_p0 = scmp.lt.s32.totalorder %s1225_s22, %s999_s12  ;;  %p1002_p1 = scmp.lt.s32.totalorder %s1000_s13, %s994_s30 }
  0x22   : > { %p996_p12 = pnand %p995_p11, %p1159_p5 }
  0x23   : > { %p1003_p2 = por %p1002_p1, %p1001_p0 }
  0x24   : > { %p997_p13 = pneg %p996_p12 }
  0x26   : > { %p1004_p3 = pnand %p1003_p2, %p997_p13 }
  0x29   : > { %v991_v10 = vpop.eup %990 }
  0x2a   : > { %417 = vperm.xlu0 %988, %v991_v10   ;;  %v993_v11 = vpop.eup %992 }
  0x2e   : > { %573 = vperm.xlu0 %988, %v993_v11  }
  0xa9   : > { %v418_v14 = vpop.permute.xlu0 %417 }
  0xaa   : > { %v420_v15 = vmul.f32 %v418_v14, %v414_v13 }
  0xac   : > { %913 = vmatmul.mubr.msk.f32.vlgmr.msra.gmra.mrb[0].mxu0 %vm423_vm1, %v420_v15 }
  0xad   : > { %933 = vmatprep.mubr.msk.f32.mxu0 %vm1060_vm0, %v1061_v12  ;;  %v574_v25 = vpop.permute.xlu0 %573 }
 0x17f   : > { %v493_v17 = vpop.f32.mrb[0].mxu0 }
 0x180   : > { %v914_v18 = vpop.f32.mrb[1].mxu0  ;;  %916 = vmatpush3.msra.mxu1 %v493_v17 }
 0x181   : > { %918 = vmatmul.mubr.msk.f32.vlgmr.msra.gmra.mrb[0].mxu1 %vm497_vm2, %v407_v16  ;;  %939 = vmatprep.subr.bf16.mxu1 %v1059_v4 }
 0x182   : > { %928 = vmatprep.mubr.msk.f32.mxu1 %vm1060_vm0, %v1061_v12  ;;  %941 = vmatpush3.bf16.msra.mxu1 %v940_v21 }
 0x183   : > { %942 = vmatprep.subr.bf16.mxu1 %v1059_v4 }
 0x186   : > { %944 = vmatpush3.bf16.msra.mxu1 %v943_v24 }
 0x254   : > { %v567_v26 = vpop.f32.mrb[0].mxu1 }
 0x255   : > { %v576_v28 = vmul.f32 %v574_v25, %v567_v26  ;;  %v919_v29 = vpop.f32.mrb[1].mxu1 }
 0x257   : > { %v584_v30 = vadd.f32 %v888_v27, %v576_v28 }
 0x259   : > { %v585_v31 = vmax.f32 %v584_v30, 0.0 }
 0x25b   : > { %v586_v32 = vmul.f32 %v585_v31, %v418_v14 }
 0x25d   : > { %929 = vmatmul.mubr.msk.f32.vlgmr.msra.gmra.mrb[2].mxu1 %vm591_vm3, %v586_v32 }
 0x330   : > { %v661_v33 = vpop.f32.mrb[2].mxu1 }
 0x331   : > { %v930_v34 = vpop.f32.mrb[3].mxu1  ;;  %932 = vmatpush3.msra.mxu0 %v661_v33 }
 0x332   : > { %934 = vmatmul.mubr.msk.f32.vlgmr.msra.gmra.mrb[2].mxu0 %vm497_vm2, %v407_v16 }
 0x405   : > { %v731_v35 = vpop.f32.mrb[2].mxu0 }
 0x406   : > { %v735_v37 = vmul.f32 %v731_v35, %v574_v25  ;;  %v935_v38 = vpop.f32.mrb[3].mxu0 }
 0x408   : > { %v743_v39 = vadd.f32 %v891_v36, %v735_v37 }
 0x40a   : > { %v744_v41 = vmax.f32 %v743_v39, 0.0 }
 0x40c   : > { %v752_v42 = vmul.f32 %v892_v40, %v744_v41 }
 0x40e   : > { %v753_v43 = vsel %vm423_vm1, %v752_v42, 0.0 }
 0x40f   : > { %754 = vadd.xlane.f32.xlu1 %v753_v43 }
 0x49c   : > { %v755_v44 = vpop.xlane.xlu1 %754 }
 0x49d   : > { %v756_v45 = vrot.slane %v755_v44, 4 }
 0x49f   : > { %v757_v46 = vadd.f32 %v756_v45, %v755_v44 }
 0x4a1   : > { %v758_v47 = vrot.slane %v757_v46, 2 }
 0x4a3   : > { %v759_v48 = vadd.f32 %v758_v47, %v757_v46 }
 0x4a5   : > { %v760_v49 = vrot.slane %v759_v48, 1 }
 0x4a7   : > { %v761_v51 = vadd.f32 %v760_v49, %v759_v48 }
 0x4a9   : > { %v763_v52 = vadd.f32 %v762_v50, %v761_v51 }
 0x4ab   : > { %766 = vperm.xlu1 %989, %v763_v52  }
 0x52a   : > { %v767_v56 = vpop.permute.xlu1 %766 }
 0x52b   : > { %v772_v57 = vrot.slane %v767_v56, %v771_v55 }
 0x52d   : > { %773 = vst [vmem:[%s390_s11] sm:$0x1] %v772_v57 }
 0x52e   : > { %1007 = shalt.err (!%p1004_p3)
}
 0x52f   : > { %s1008_s14 = scalar_lea.hbm %s1223_s28, 16  ;;  %s1012_s11 = scalar_lea.hbm %s1275_s10, 128 }
 0x530   : > { %p1009_p4 = scmp.ne.s32.totalorder %s1223_s28, %s1008_s14  ;;  %p1013_p9 = scmp.lt.u32.totalorder %s1223_s28, %s1275_s10 }
 0x531   : > { %p1014_p10 = scmp.lt.u32.totalorder %s1012_s11, %s1008_s14  ;;  %p1016_p12 = scmp.lt.u32.totalorder %s1008_s14, %s1223_s28 }
 0x532   : > { %p1010_p7 = pnand %p1009_p4, %p1159_p5 }
 0x533   : > { %p1015_p11 = por %p1014_p10, %p1013_p9 }
 0x534   : > { %p1011_p8 = pneg %p1010_p7 }
 0x535   : > { %p1017_p13 = por %p1016_p12, %p1015_p11 }
 0x537   : > { %p1018_p0 = pnand %p1017_p13, %p1011_p8 }
 0x539   : > { %1021 = shalt.err (!%p1018_p0)
}
 0x53a   : > { %945 = dma.vmem_to_hbm [thread:$0]  (%p1159_p5), %s1225_s22, 16, %s1223_s28, %s775_s29  }
 0x53b PF: > { %p951_p1 = scmp.ge.s32.totalorder %s1056_s18, 2  ;;  %s799_s30 = sand.u32 1, %s1044_s15  }
 0x53c   : > { %s800_s9 = scalar_lea.sflag [#allocation4], %s799_s30 }
 0x53d   : > { %p948_p2 = pnand %p951_p1, %p1163_p6 }
 0x53f   : > { %1039 = dma.done.wait (!%p948_p2), %s800_s9, 16  }
 0x540   : > { %1041 = vsyncadd (!%p948_p2), %s800_s9, 4294967280  ;;  %p22_p3 = scmp.ge.s32.totalorder %s1146_s20, 10   ;;  %s1278_s15 = smov %s1048_s16 }
 0x541   : > { %s1279_s16 = smov %s1052_s17  ;;  %s1280_s17 = smov %s1157_s23 }
 0x542   : > { %s1281_s18 = smov %s1146_s20  ;;  %24 = sbr.rel (!%p22_p3) target bundleno = 6 (0x6), region = 104 }
 0x549   :  { %804 = vsyncpa [#allocation4], 1 }
 0x54a   :  { %806 = vsyncpa [#allocation4 + $0x1], 1 }

</bundles_post_ra>
